<compile_context>
chip_gen: v6e
topology: v6e:2x2x1
jax: 0.10.0
libtpu: 0.0.40
codegen_flags: <defaults>
</compile_context>

<pallas_src>
from functools import partial

import jax
import jax.numpy as jnp
import numpy as np
from jax.experimental import pallas as pl
from jax.experimental.pallas import tpu as pltpu


def _char_emb_kernel(lens_ref, gi_ref, h0_ref, wrec_ref, bhhn_ref, wcT_ref, bc_ref,
                     o_ref, h_scr, a_scr, *, B, N):
    """One GRU timestep per grid invocation + compat epilogue on the last step.

    lens_ref : [BN, 1]     int32 sequence lengths, rows ordered (b, n)
    gi_ref   : [1, BN, 6H] input projections for THIS timestep (biases folded,
                           backward direction already time-reversed, gate-paired cols)
    h0_ref   : [BN, 2H]    initial hidden, fwd || bwd on lanes, rows ordered (b, n)
    wrec_ref : [2H, 6H]    block-diagonal recurrent weight, gate-paired columns
    bhhn_ref : [1, 2H]     hidden bias of the n-gate (fwd || bwd)
    wcT_ref  : [2H, C]     compat weight, stacked & pre-transposed (== wc.T)
    bc_ref   : [1, C]
    o_ref    : [B*N, C]    output, rows ordered (b_out, n); wrapper reshapes to [B,N,C]
    h_scr    : [BN, 2H]    VMEM carry of the packed hidden state
    a_scr    : [BN, 2H]    VMEM staging for the h.view(B,-1)-ordered hidden (epilogue)
    """
    t = pl.program_id(0)
    T = pl.num_programs(0)
    BN, H2 = h_scr.shape
    H = H2 // 2

    @pl.when(t == 0)
    def _():
        h_scr[...] = h0_ref[...]

    h = h_scr[...]                                               # [BN, 2H]
    gi = gi_ref[0]                                               # [BN, 6H]
    gh = jnp.dot(h, wrec_ref[...], preferred_element_type=jnp.float32)  # 1 MXU dot/step

    rz = jax.nn.sigmoid(gi[:, :4 * H] + gh[:, :4 * H])           # [BN, 4H]
    r = rz[:, :2 * H]                                            # aligned with h layout
    z = rz[:, 2 * H:]
    # bhhn_ref is [1, 2H]: implicit sublane broadcast at use (no broadcast_to).
    n = jnp.tanh(gi[:, 4 * H:] + r * (gh[:, 4 * H:] + bhhn_ref[...]))
    h_new = (1.0 - z) * n + z * h

    # Packed-sequence length masking, computed in-kernel (no [T,BN,2H] mask tensor):
    # fwd lanes (0:H) are valid while t < len; bwd lanes (H:2H) while T-1-t < len.
    lane = jax.lax.broadcasted_iota(jnp.int32, (1, H2), 1)
    step = jnp.where(lane < H, t, T - 1 - t)                     # [1, 2H] int32
    valid = step < lens_ref[...]                                 # -> [BN, 2H] bool
    h_scr[...] = jnp.where(valid, h_new, h)                      # single vselect

    @pl.when(t == T - 1)
    def _():
        # Compat linear with torch's h.view(batch, -1) quirk: output row b_out consumes
        # H-blocks m0 = 2*b_out and m1 = 2*b_out+1 of the per-char (dir, batch, hidden)
        # flattened hidden; with rows ordered (b, n) those blocks are contiguous slices.
        hf = h_scr[...]
        for b_out in range(B):                                   # static, runs once
            d0, bb0 = divmod(2 * b_out, B)
            d1, bb1 = divmod(2 * b_out + 1, B)
            a_scr[b_out * N:(b_out + 1) * N, 0:H] = hf[bb0 * N:(bb0 + 1) * N,
                                                       d0 * H:(d0 + 1) * H]
            a_scr[b_out * N:(b_out + 1) * N, H:2 * H] = hf[bb1 * N:(bb1 + 1) * N,
                                                           d1 * H:(d1 + 1) * H]
        # One MXU dot + one full-tensor store (replaces 2B tiny dots + B masked writes).
        o_ref[...] = (jnp.dot(a_scr[...], wcT_ref[...],
                              preferred_element_type=jnp.float32) + bc_ref[...])


def char_embedding_initializer(attributes, attr_lens, h0, params):
    """attributes: [N, B, T, E], attr_lens: [N, B] int (>=1), h0: [2, B, H] -> R: [B, N, C]."""
    N, B, T, E = attributes.shape
    H = params["whh_f"].shape[1]
    C = params["wc"].shape[0]
    BN = B * N
    f32 = jnp.float32

    wih_f, whh_f = params["wih_f"], params["whh_f"]
    wih_b, whh_b = params["wih_b"], params["whh_b"]
    bih_f, bhh_f = params["bih_f"], params["bhh_f"]
    bih_b, bhh_b = params["bih_b"], params["bhh_b"]
    wc, bc = params["wc"], params["bc"]

    def pair(a_f, a_b):  # [..., 3H] x2 -> [..., 6H] gate-paired: r_f r_b z_f z_b n_f n_b
        return jnp.concatenate(
            [a_f[..., 0:H], a_b[..., 0:H],
             a_f[..., H:2 * H], a_b[..., H:2 * H],
             a_f[..., 2 * H:3 * H], a_b[..., 2 * H:3 * H]], axis=-1)

    # --- input projections for all chars/steps/directions: two wide matmuls (XLA) ---
    # rows ordered (b, n): xf[s, b*N + n, :] = attributes[n, b, s, :]
    xf = jnp.transpose(attributes, (2, 1, 0, 3)).reshape(T, BN, E).astype(f32)
    xb = xf[::-1]                                    # backward direction: reversed time
    gi_f = xf @ wih_f.T                              # [T, BN, 3H]
    gi_b = xb @ wih_b.T                              # [T, BN, 3H]
    bias_ih = pair(bih_f, bih_b)                     # [1, 6H]
    bias_hh = pair(bhh_f, bhh_b)                     # [1, 6H]
    gi_bias = jnp.concatenate(                       # fold b_ih (all) + b_hh (r,z only)
        [bias_ih[:, :4 * H] + bias_hh[:, :4 * H], bias_ih[:, 4 * H:]], axis=-1)
    gi_seq = pair(gi_f, gi_b) + gi_bias              # [T, BN, 6H]  (f32; see notes re bf16)
    bhh_n = bias_hh[:, 4 * H:]                       # [1, 2H] (n-gate hidden bias)

    # --- block-diagonal recurrent weight, pre-transposed, gate-paired columns ---
    Z = jnp.zeros((H, H), f32)
    w_rec = jnp.concatenate([
        jnp.concatenate([whh_f[0:H].T, Z, whh_f[H:2 * H].T, Z, whh_f[2 * H:].T, Z], axis=1),
        jnp.concatenate([Z, whh_b[0:H].T, Z, whh_b[H:2 * H].T, Z, whh_b[2 * H:].T], axis=1),
    ], axis=0)                                       # [2H, 6H]

    # --- tiny per-stream lengths (mask is computed in-kernel now) ---
    lens_col = attr_lens.astype(jnp.int32).T.reshape(BN, 1)       # row order (b, n)

    # --- initial hidden packed as [BN, 2H] (same h0 for every character) ---
    h_init = jnp.repeat(jnp.concatenate([h0[0], h0[1]], axis=1), N, axis=0)

    # --- compat weight stacked & pre-transposed: one epilogue dot ---
    wcT = wc.T.astype(f32)                           # [2H, C]

    kernel = partial(_char_emb_kernel, B=B, N=N)

    out = pl.pallas_call(
        kernel,
        out_shape=jax.ShapeDtypeStruct((BN, C), f32),
        grid_spec=pltpu.PrefetchScalarGridSpec(
            num_scalar_prefetch=0,
            grid=(T,),                               # streamed recurrence over time
            in_specs=[
                pl.BlockSpec((BN, 1), lambda t: (0, 0)),            # lens (resident)
                pl.BlockSpec((1, BN, 6 * H), lambda t: (t, 0, 0)),  # gi, one slice / step
                pl.BlockSpec((BN, 2 * H), lambda t: (0, 0)),        # h0
                pl.BlockSpec((2 * H, 6 * H), lambda t: (0, 0)),     # w_rec
                pl.BlockSpec((1, 2 * H), lambda t: (0, 0)),         # bhh_n
                pl.BlockSpec((2 * H, C), lambda t: (0, 0)),         # wc.T
                pl.BlockSpec((1, C), lambda t: (0, 0)),             # bc
            ],
            out_specs=pl.BlockSpec((BN, C), lambda t: (0, 0)),      # written at t == T-1
            scratch_shapes=[pltpu.VMEM((BN, 2 * H), f32),           # h carry
                            pltpu.VMEM((BN, 2 * H), f32)],          # epilogue staging
        ),
        # Sequential carry via scratch -> the T axis must be "arbitrary".
        # TODO(synk): add a leading 'parallel' BN-block grid axis for v7x megacore once
        # BN is large enough to tile (independent (b, n) GRU streams).
        compiler_params=pltpu.CompilerParams(dimension_semantics=("arbitrary",)),
    )(lens_col, gi_seq, h_init, w_rec, bhh_n, wcT, bc)

    return out.reshape(B, N, C)                      # leading-dim split only (free)


# ----------------------------- pure-JAX reference -----------------------------

def _gru_dir_ref(x, lens, h0, wih, whh, bih, bhh, reverse):
    """One GRU direction over x:[B,T,E] with length masking. Returns final hidden [B,H]."""
    B, T, E = x.shape
    H = h0.shape[-1]
    h = h0
    ts = range(T - 1, -1, -1) if reverse else range(T)
    for t in ts:
        gi = x[:, t, :] @ wih.T + bih
        gh = h @ whh.T + bhh
        r = jax.nn.sigmoid(gi[:, 0:H] + gh[:, 0:H])
        z = jax.nn.sigmoid(gi[:, H:2 * H] + gh[:, H:2 * H])
        n = jnp.tanh(gi[:, 2 * H:] + r * gh[:, 2 * H:])
        h_new = (1.0 - z) * n + z * h
        valid = jnp.float32(t) < lens                 # [B, 1]
        h = jnp.where(valid, h_new, h)
    return h


def reference(attributes, attr_lens, h0, params):
    N, B, T, E = attributes.shape
    H = params["whh_f"].shape[1]
    lens = attr_lens.astype(jnp.float32).reshape(N, B, 1)
    outs = []
    for i in range(N):
        hf = _gru_dir_ref(attributes[i], lens[i], h0[0], params["wih_f"], params["whh_f"],
                          params["bih_f"], params["bhh_f"], reverse=False)
        hb = _gru_dir_ref(attributes[i], lens[i], h0[1], params["wih_b"], params["whh_b"],
                          params["bih_b"], params["bhh_b"], reverse=True)
        hcat = jnp.stack([hf, hb], axis=0).reshape(B, 2 * H)   # torch h.view(B, -1) quirk
        outs.append(hcat @ params["wc"].T + params["bc"][0])
    return jnp.stack(outs, axis=1)                             # [B, N, C]


if __name__ == "__main__":
    # hps (small): word_emb_size E, char_hidden_size H, char_emb_size C, max_num_char N
    E, H, C, N = 16, 8, 16, 3
    B, T = 2, 5                      # batch, num_attr (sequence length)

    key = jax.random.PRNGKey(0)
    ks = jax.random.split(key, 16)
    s = 1.0 / np.sqrt(H)             # PyTorch GRU init scale
    u = lambda k, shape, a: jax.random.uniform(k, shape, jnp.float32, minval=-a, maxval=a)

    params = {
        "wih_f": u(ks[0], (3 * H, E), s), "whh_f": u(ks[1], (3 * H, H), s),
        "bih_f": u(ks[2], (1, 3 * H), s), "bhh_f": u(ks[3], (1, 3 * H), s),
        "wih_b": u(ks[4], (3 * H, E), s), "whh_b": u(ks[5], (3 * H, H), s),
        "bih_b": u(ks[6], (1, 3 * H), s), "bhh_b": u(ks[7], (1, 3 * H), s),
        "wc":    u(ks[8], (C, 2 * H), 1.0 / np.sqrt(2 * H)),
        "bc":    u(ks[9], (1, C), 1.0 / np.sqrt(2 * H)),
    }

    attributes = jax.random.normal(ks[10], (N, B, T, E), jnp.float32)
    attr_lens = jnp.array([[3, 5], [1, 4], [5, 2]], dtype=jnp.int32)   # [N, B]
    assert int(attr_lens.min()) >= 1, "packed sequences require length >= 1"

    # deterministic xavier-uniform h0 (torch redraws this randomly every call)
    xav = np.sqrt(6.0 / (B * H + 2 * H))
    h0 = u(ks[11], (2, B, H), xav)

    R = jax.jit(char_embedding_initializer)(attributes, attr_lens, h0, params)
    R = jax.block_until_ready(R)
    assert R.shape == (B, N, C), R.shape

    R_ref = jax.block_until_ready(reference(attributes, attr_lens, h0, params))
    np.testing.assert_allclose(np.asarray(R), np.asarray(R_ref), rtol=1e-4, atol=1e-4)

    print("KERNEL_OK")
</pallas_src>

<mosaic_0001>
module attributes {stable_mosaic.version = 11 : i64} {
  func.func @_char_emb_kernel(%arg0: i32, %arg1: memref<6x1xi32, #tpu.memory_space<vmem>>, %arg2: memref<1x6x48xf32, #tpu.memory_space<vmem>>, %arg3: memref<6x16xf32, #tpu.memory_space<vmem>>, %arg4: memref<16x48xf32, #tpu.memory_space<vmem>>, %arg5: memref<1x16xf32, #tpu.memory_space<vmem>>, %arg6: memref<16x16xf32, #tpu.memory_space<vmem>>, %arg7: memref<1x16xf32, #tpu.memory_space<vmem>>, %arg8: memref<6x16xf32, #tpu.memory_space<vmem>>, %arg9: memref<6x16xf32, #tpu.memory_space<vmem>>, %arg10: memref<6x16xf32, #tpu.memory_space<vmem>>) attributes {dimension_semantics = [#tpu.dimension_semantics<arbitrary>], iteration_bounds = array<i64: 5>, scalar_prefetch = 0 : i64, scratch_operands = 2 : i64, tpu.core_type = #tpu.core_type<tc>, window_params = [{pipeline_mode = #tpu.pipeline_mode<synchronous>, transform_indices = @transform_0, window_bounds = array<i64: 6, 1>}, {transform_indices = @transform_1, window_bounds = array<i64: 1, 6, 48>}, {pipeline_mode = #tpu.pipeline_mode<synchronous>, transform_indices = @transform_2, window_bounds = array<i64: 6, 16>}, {pipeline_mode = #tpu.pipeline_mode<synchronous>, transform_indices = @transform_3, window_bounds = array<i64: 16, 48>}, {pipeline_mode = #tpu.pipeline_mode<synchronous>, transform_indices = @transform_4, window_bounds = array<i64: 1, 16>}, {pipeline_mode = #tpu.pipeline_mode<synchronous>, transform_indices = @transform_5, window_bounds = array<i64: 16, 16>}, {pipeline_mode = #tpu.pipeline_mode<synchronous>, transform_indices = @transform_6, window_bounds = array<i64: 1, 16>}, {pipeline_mode = #tpu.pipeline_mode<synchronous>, transform_indices = @transform_7, window_bounds = array<i64: 6, 16>}]} {
    %c0_i32 = arith.constant 0 : i32
    %0 = arith.cmpi eq, %arg0, %c0_i32 : i32
    %1 = arith.extui %0 : i1 to i32
    %c0_i32_0 = arith.constant 0 : i32
    %2 = arith.cmpi ne, %1, %c0_i32_0 : i32
    scf.if %2 {
      %c0_17 = arith.constant 0 : index
      %c0_18 = arith.constant 0 : index
      %47 = vector.load %arg3[%c0_17, %c0_18] : memref<6x16xf32, #tpu.memory_space<vmem>>, vector<6x16xf32>
      %c0_19 = arith.constant 0 : index
      %c0_20 = arith.constant 0 : index
      %48 = vector.load %arg9[%c0_19, %c0_20] : memref<6x16xf32, #tpu.memory_space<vmem>>, vector<6x16xf32>
      tpu.vector_store %arg9[%c0_19, %c0_20], %47 {strides = array<i32>} : memref<6x16xf32, #tpu.memory_space<vmem>>, vector<6x16xf32>,
    } else {
    }
    %c0 = arith.constant 0 : index
    %c0_1 = arith.constant 0 : index
    %3 = vector.load %arg9[%c0, %c0_1] : memref<6x16xf32, #tpu.memory_space<vmem>>, vector<6x16xf32>
    %c0_2 = arith.constant 0 : index
    %c0_3 = arith.constant 0 : index
    %c0_4 = arith.constant 0 : index
    %4 = vector.load %arg2[%c0_2, %c0_3, %c0_4] : memref<1x6x48xf32, #tpu.memory_space<vmem>>, vector<1x6x48xf32>
    %5 = vector.shape_cast %4 : vector<1x6x48xf32> to vector<6x48xf32>
    %c0_5 = arith.constant 0 : index
    %c0_6 = arith.constant 0 : index
    %6 = vector.load %arg4[%c0_5, %c0_6] : memref<16x48xf32, #tpu.memory_space<vmem>>, vector<16x48xf32>
    %cst = arith.constant dense<0.000000e+00> : vector<6x48xf32>
    %7 = tpu.matmul %3, %6, %cst {dimension_numbers = #tpu.dot_dimension_numbers<[1], [0], [0], [1], [0, 0, 1, 1], [], []>} : vector<6x16xf32>, vector<16x48xf32>, vector<6x48xf32> -> vector<6x48xf32>
    %8 = vector.extract_strided_slice %5 {offsets = [0, 0], sizes = [6, 32], strides = [1, 1]} : vector<6x48xf32> to vector<6x32xf32>
    %9 = vector.extract_strided_slice %7 {offsets = [0, 0], sizes = [6, 32], strides = [1, 1]} : vector<6x48xf32> to vector<6x32xf32>
    %10 = arith.addf %8, %9 : vector<6x32xf32>
    %11 = arith.negf %10 : vector<6x32xf32>
    %12 = math.exp %11 : vector<6x32xf32>
    %cst_7 = arith.constant 1.000000e+00 : f32
    %13 = vector.broadcast %cst_7 : f32 to vector<6x32xf32>
    %14 = arith.addf %13, %12 : vector<6x32xf32>
    %15 = arith.divf %13, %14 : vector<6x32xf32>
    %16 = vector.extract_strided_slice %15 {offsets = [0, 0], sizes = [6, 16], strides = [1, 1]} : vector<6x32xf32> to vector<6x16xf32>
    %17 = vector.extract_strided_slice %15 {offsets = [0, 16], sizes = [6, 16], strides = [1, 1]} : vector<6x32xf32> to vector<6x16xf32>
    %18 = vector.extract_strided_slice %5 {offsets = [0, 32], sizes = [6, 16], strides = [1, 1]} : vector<6x48xf32> to vector<6x16xf32>
    %19 = vector.extract_strided_slice %7 {offsets = [0, 32], sizes = [6, 16], strides = [1, 1]} : vector<6x48xf32> to vector<6x16xf32>
    %c0_8 = arith.constant 0 : index
    %c0_9 = arith.constant 0 : index
    %20 = vector.load %arg5[%c0_8, %c0_9] : memref<1x16xf32, #tpu.memory_space<vmem>>, vector<1x16xf32>
    %21 = vector.broadcast %20 : vector<1x16xf32> to vector<6x16xf32>
    %22 = arith.addf %19, %21 : vector<6x16xf32>
    %23 = arith.mulf %16, %22 : vector<6x16xf32>
    %24 = arith.addf %18, %23 : vector<6x16xf32>
    %25 = math.tanh %24 : vector<6x16xf32>
    %cst_10 = arith.constant 1.000000e+00 : f32
    %26 = vector.broadcast %cst_10 : f32 to vector<6x16xf32>
    %27 = arith.subf %26, %17 : vector<6x16xf32>
    %28 = arith.mulf %27, %25 : vector<6x16xf32>
    %29 = arith.mulf %17, %3 : vector<6x16xf32>
    %30 = arith.addf %28, %29 : vector<6x16xf32>
    %31 = tpu.iota {dimensions = array<i32: 1>} : vector<1x16xi32>
    %c8_i32 = arith.constant 8 : i32
    %32 = vector.broadcast %c8_i32 : i32 to vector<1x16xi32>
    %33 = arith.cmpi slt, %31, %32 : vector<1x16xi32>
    %c4_i32 = arith.constant 4 : i32
    %34 = arith.subi %c4_i32, %arg0 : i32
    %35 = vector.broadcast %arg0 : i32 to vector<1x16xi32>
    %36 = vector.broadcast %34 : i32 to vector<1x16xi32>
    %37 = arith.select %33, %35, %36 : vector<1x16xi1>, vector<1x16xi32>
    %c0_11 = arith.constant 0 : index
    %c0_12 = arith.constant 0 : index
    %38 = vector.load %arg1[%c0_11, %c0_12] : memref<6x1xi32, #tpu.memory_space<vmem>>, vector<6x1xi32>
    %39 = vector.broadcast %37 : vector<1x16xi32> to vector<6x16xi32>
    %40 = vector.broadcast %38 : vector<6x1xi32> to vector<6x16xi32>
    %41 = arith.cmpi slt, %39, %40 : vector<6x16xi32>
    %42 = arith.select %41, %30, %3 : vector<6x16xi1>, vector<6x16xf32>
    %c0_13 = arith.constant 0 : index
    %c0_14 = arith.constant 0 : index
    %43 = vector.load %arg9[%c0_13, %c0_14] : memref<6x16xf32, #tpu.memory_space<vmem>>, vector<6x16xf32>
    tpu.vector_store %arg9[%c0_13, %c0_14], %42 {strides = array<i32>} : memref<6x16xf32, #tpu.memory_space<vmem>>, vector<6x16xf32>,
    %c4_i32_15 = arith.constant 4 : i32
    %44 = arith.cmpi eq, %arg0, %c4_i32_15 : i32
    %45 = arith.extui %44 : i1 to i32
    %c0_i32_16 = arith.constant 0 : i32
    %46 = arith.cmpi ne, %45, %c0_i32_16 : i32
    scf.if %46 {
      %c0_17 = arith.constant 0 : index
      %c0_18 = arith.constant 0 : index
      %47 = vector.load %arg9[%c0_17, %c0_18] : memref<6x16xf32, #tpu.memory_space<vmem>>, vector<6x16xf32>
      %48 = vector.extract_strided_slice %47 {offsets = [0, 0], sizes = [3, 8], strides = [1, 1]} : vector<6x16xf32> to vector<3x8xf32>
      %c0_19 = arith.constant 0 : index
      %c0_20 = arith.constant 0 : index
      %49 = vector.load %arg10[%c0_19, %c0_20] : memref<6x16xf32, #tpu.memory_space<vmem>>, vector<3x8xf32>
      tpu.vector_store %arg10[%c0_19, %c0_20], %48 {strides = array<i32>} : memref<6x16xf32, #tpu.memory_space<vmem>>, vector<3x8xf32>,
      %50 = vector.extract_strided_slice %47 {offsets = [3, 0], sizes = [3, 8], strides = [1, 1]} : vector<6x16xf32> to vector<3x8xf32>
      %c0_21 = arith.constant 0 : index
      %c8 = arith.constant 8 : index
      %51 = vector.load %arg10[%c0_21, %c8] : memref<6x16xf32, #tpu.memory_space<vmem>>, vector<3x8xf32>
      tpu.vector_store %arg10[%c0_21, %c8], %50 {strides = array<i32>} : memref<6x16xf32, #tpu.memory_space<vmem>>, vector<3x8xf32>,
      %52 = vector.extract_strided_slice %47 {offsets = [0, 8], sizes = [3, 8], strides = [1, 1]} : vector<6x16xf32> to vector<3x8xf32>
      %c3 = arith.constant 3 : index
      %c0_22 = arith.constant 0 : index
      %53 = vector.load %arg10[%c3, %c0_22] : memref<6x16xf32, #tpu.memory_space<vmem>>, vector<3x8xf32>
      tpu.vector_store %arg10[%c3, %c0_22], %52 {strides = array<i32>} : memref<6x16xf32, #tpu.memory_space<vmem>>, vector<3x8xf32>,
      %54 = vector.extract_strided_slice %47 {offsets = [3, 8], sizes = [3, 8], strides = [1, 1]} : vector<6x16xf32> to vector<3x8xf32>
      %c3_23 = arith.constant 3 : index
      %c8_24 = arith.constant 8 : index
      %55 = vector.load %arg10[%c3_23, %c8_24] : memref<6x16xf32, #tpu.memory_space<vmem>>, vector<3x8xf32>
      tpu.vector_store %arg10[%c3_23, %c8_24], %54 {strides = array<i32>} : memref<6x16xf32, #tpu.memory_space<vmem>>, vector<3x8xf32>,
      %c0_25 = arith.constant 0 : index
      %c0_26 = arith.constant 0 : index
      %56 = vector.load %arg10[%c0_25, %c0_26] : memref<6x16xf32, #tpu.memory_space<vmem>>, vector<6x16xf32>
      %c0_27 = arith.constant 0 : index
      %c0_28 = arith.constant 0 : index
      %57 = vector.load %arg6[%c0_27, %c0_28] : memref<16x16xf32, #tpu.memory_space<vmem>>, vector<16x16xf32>
      %cst_29 = arith.constant dense<0.000000e+00> : vector<6x16xf32>
      %58 = tpu.matmul %56, %57, %cst_29 {dimension_numbers = #tpu.dot_dimension_numbers<[1], [0], [0], [1], [0, 0, 1, 1], [], []>} : vector<6x16xf32>, vector<16x16xf32>, vector<6x16xf32> -> vector<6x16xf32>
      %c0_30 = arith.constant 0 : index
      %c0_31 = arith.constant 0 : index
      %59 = vector.load %arg7[%c0_30, %c0_31] : memref<1x16xf32, #tpu.memory_space<vmem>>, vector<1x16xf32>
      %60 = vector.broadcast %59 : vector<1x16xf32> to vector<6x16xf32>
      %61 = arith.addf %58, %60 : vector<6x16xf32>
      %c0_32 = arith.constant 0 : index
      %c0_33 = arith.constant 0 : index
      %62 = vector.load %arg8[%c0_32, %c0_33] : memref<6x16xf32, #tpu.memory_space<vmem>>, vector<6x16xf32>
      tpu.vector_store %arg8[%c0_32, %c0_33], %61 {strides = array<i32>} : memref<6x16xf32, #tpu.memory_space<vmem>>, vector<6x16xf32>,
    } else {
    }
    return
  }
  func.func @transform_0(%arg0: i32) -> (i32, i32) {
    %c0_i32 = arith.constant 0 : i32
    %c0_i32_0 = arith.constant 0 : i32
    %c0_i32_1 = arith.constant 0 : i32
    return %c0_i32, %c0_i32_0 : i32, i32
  }
  func.func @transform_1(%arg0: i32) -> (i32, i32, i32) {
    %c0_i32 = arith.constant 0 : i32
    %c0_i32_0 = arith.constant 0 : i32
    %c0_i32_1 = arith.constant 0 : i32
    return %arg0, %c0_i32, %c0_i32_0 : i32, i32, i32
  }
  func.func @transform_2(%arg0: i32) -> (i32, i32) {
    %c0_i32 = arith.constant 0 : i32
    %c0_i32_0 = arith.constant 0 : i32
    %c0_i32_1 = arith.constant 0 : i32
    return %c0_i32, %c0_i32_0 : i32, i32
  }
  func.func @transform_3(%arg0: i32) -> (i32, i32) {
    %c0_i32 = arith.constant 0 : i32
    %c0_i32_0 = arith.constant 0 : i32
    %c0_i32_1 = arith.constant 0 : i32
    return %c0_i32, %c0_i32_0 : i32, i32
  }
  func.func @transform_4(%arg0: i32) -> (i32, i32) {
    %c0_i32 = arith.constant 0 : i32
    %c0_i32_0 = arith.constant 0 : i32
    %c0_i32_1 = arith.constant 0 : i32
    return %c0_i32, %c0_i32_0 : i32, i32
  }
  func.func @transform_5(%arg0: i32) -> (i32, i32) {
    %c0_i32 = arith.constant 0 : i32
    %c0_i32_0 = arith.constant 0 : i32
    %c0_i32_1 = arith.constant 0 : i32
    return %c0_i32, %c0_i32_0 : i32, i32
  }
  func.func @transform_6(%arg0: i32) -> (i32, i32) {
    %c0_i32 = arith.constant 0 : i32
    %c0_i32_0 = arith.constant 0 : i32
    %c0_i32_1 = arith.constant 0 : i32
    return %c0_i32, %c0_i32_0 : i32, i32
  }
  func.func @transform_7(%arg0: i32) -> (i32, i32) {
    %c0_i32 = arith.constant 0 : i32
    %c0_i32_0 = arith.constant 0 : i32
    %c0_i32_1 = arith.constant 0 : i32
    return %c0_i32, %c0_i32_0 : i32, i32
  }
}

</mosaic_0001>

<bundles_post_ra>
// kernel: char_embedding_initializer.1
= control target key start
LH: loop header
LB: loop body
LE: loop exit
PB: predicated region body
PF: predicated region fallthrough
CT: control target
= control target key end

     0   :  { %s654_s24 = smov 0   ;;  %s712_s0 = inlined_call_operand.vmem [shape: s32[6,1], index: 0, kind: input, shape index: {}]   ;;  %s713_s1 = inlined_call_operand.vmem [shape: f32[5,6,48], index: 1, kind: input, shape index: {}]   ;;  %s714_s2 = inlined_call_operand.vmem [shape: f32[6,16], index: 2, kind: input, shape index: {}]   ;;  %s715_s3 = inlined_call_operand.vmem [shape: f32[16,48], index: 3, kind: input, shape index: {}]   ;;  %s716_s4 = inlined_call_operand.vmem [shape: f32[1,16], index: 4, kind: input, shape index: {}]   ;;  %s717_s5 = inlined_call_operand.vmem [shape: f32[16,16], index: 5, kind: input, shape index: {}]   ;;  %s718_s6 = inlined_call_operand.vmem [shape: f32[1,16], index: 6, kind: input, shape index: {}]   ;;  %s719_s7 = inlined_call_operand.vmem [shape: f32[6,16], index: 7, kind: output, shape index: {}]  }
   0x1 LB: > { %s660_s25 = sadd.s32 4294967295, %s601_s24   ;;  %p537_p0 = scmp.ge.s32.totalorder %s601_s24, 1  ;;  %s601_s24 = sphi %s654_s24, %s17_s24  }
   0x2   : > { %p231_p1 = scmp.lt.s32.totalorder %s601_s24, 6 }
   0x4   : > { %p232_p2 = pnand %p537_p0, %p231_p1 }
   0x5   : > { %p257_p3 = scmp.lt.s32.totalorder (!%p232_p2), %s660_s25, 4  ;;  %p539_p4 = scmp.ne.s32.totalorder (!%p232_p2), %s660_s25, 0 }
   0x6   : > { %235 = sbr.rel (%p232_p2) target bundleno = 1035 (0x40b), region = 48 }
   0xb   : > { %s258_s26 = scalar_select %p257_p3, %s660_s25, 4 }
   0xc   : > { %264 = sbr.rel (%p539_p4) target bundleno = 19 (0x13), region = 52 }
   0xd   : > { %s538_s27 = sshll.u32 %s258_s26, 3 }
   0xe   : > { %s669_s30 = scalar_lea.vmem %s713_s1, %s538_s27 }
  0x11   : > { %v265_v0 = vld [vmem:[%s714_s2] sm:$0x3f]  ;;  %vm266_vm0 = vcmask 128000  }
  0x12   : > { %267 = vst.msk [vmem:[#allocation2] sm:$0x3f] %vm266_vm0, %v265_v0 }
  0x13 PF: > { %v271_v1 = vld [vmem:[%s715_s3 + $0x8] sm:$0xff]  ;;  %v603_v2 = vmov 0.0   ;;  %v270_v3 = vld [vmem:[%s715_s3] sm:$0xff]  ;;  %vm604_vm1 = vmmov 0   ;;  %vm272_vm2 = vcmask 130048   ;;  %s605_s16 = smov 32   ;;  %v385_v29 = vlaneseq }
  0x14   : > { %554 = vmatprep.subr.mxu0 %v603_v2  ;;  %558 = vmatprep.mubr.msk.f32.mxu0 %vm604_vm1, %v603_v2  ;;  %v542_v4 = vld [vmem:[%s716_s4] ss:$0 sm:$0xff]  ;;  %s606_s17 = smov 96   ;;  %s607_s18 = smov 16   ;;  %v608_v18 = vmov 0   ;;  %v389_v31 = vstv %s660_s25  ;;  %vm402_vm5 = vcmask 128000  }
  0x15   : > { %555 = vmatpush3.msra.mxu0 %v271_v1  ;;  %359 = vrot.lane.b32.xlu0 %v542_v4, %s605_s16  ;;  %v269_v10 = vld [vmem:[%s669_s30] sm:$0x3f]  ;;  %s609_s19 = smov 112   ;;  %v386_v30 = vand.u32 127, %v385_v29  ;;  %s388_s22 = ssub.s32 4, %s660_s25 }
  0x16   : > { %556 = vmatprep.subr.mxu0 %v603_v2  ;;  %587 = vset.pattern.permute.xlu1 %v608_v18  ;;  %v392_v22 = vld [vmem:[%s712_s0] sm:$0x3f]  ;;  %v390_v32 = vstv %s388_s22  ;;  %p543_p5 = scmp.ne.s32.totalorder %s660_s25, 4 }
  0x17   : > { %557 = vmatpush3.msra.mxu0 %v270_v3  ;;  %588 = vset.pattern.permute.xlu0 %v608_v18  ;;  %vm387_vm3 = vcmp.lt.s32.totalorder %v386_v30, 8  ;;  %s610_s23 = smov (!%p543_p5), 120   ;;  %s613_s25 = smov (!%p543_p5), 8  }
  0x18   : > { %v391_v33 = vsel %vm387_vm3, %v389_v31, %v390_v32 }
  0x19   : > { %v268_v5 = vld [vmem:[#allocation2] sm:$0x3f] }
  0x1a   : > { %559 = vmatmul.mubr.msk.f32.vlgmr.msra.gmra.mxu0 %vm272_vm2, %v268_v5 }
  0x87   : > { %v360_v6 = vpop.permute.xlu0 %359 }
  0xda   : > { %v342_v7 = vpop.f32.mrf.mxu0 }
  0xdb   : > { %v362_v8 = vadd.f32 %v360_v6, %v342_v7  ;;  %v346_v11 = vadd.f32 %v342_v7, %v269_v10 }
  0xdc   : > { %v560_v9 = vpop.f32.mrf.mxu0 }
  0xdd   : > { %364 = vrot.lane.b32.xlu0 %v362_v8, %s606_s17  ;;  %v541_v12 = vmul.f32 -1.442695, %v346_v11 }
  0xdf   : > { %589 = vpow2.f32 %v541_v12 }
  0xe1   : > { %380 = vrot.lane.b32.xlu0 %v268_v5, %s607_s18 }
  0xec   : > { %v590_v13 = vpop.eup %589 }
  0xed   : > { %v350_v14 = vadd.f32 1.0, %v590_v13 }
  0xef   : > { %591 = vrcp.f32 %v350_v14 }
  0xfc   : > { %v592_v15 = vpop.eup %591 }
  0xfd   : > { %v374_v24 = vsub.f32 1.0, %v592_v15 }
 0x14f   : > { %v365_v16 = vpop.permute.xlu0 %364 }
 0x150   : > { %v367_v17 = vmul.f32 %v592_v15, %v365_v16 }
 0x152   : > { %369 = vrot.lane.b32.xlu1 %v367_v17, %s605_s16 }
 0x153   : > { %v381_v23 = vpop.permute.xlu0 %380 }
 0x154   : > { %v383_v26 = vmul.f32 %v592_v15, %v381_v23 }
 0x1c4   : > { %v370_v19 = vpop.permute.xlu1 %369 }
 0x1c5   : > { %v372_v20 = vadd.f32 %v370_v19, %v269_v10 }
 0x1c7   : > { %593 = vtanh.f32 %v372_v20 }
 0x1d4   : > { %v594_v21 = vpop.eup %593 }
 0x1d5   : > { %376 = vrot.lane.b32.xlu1 %v594_v21, %s609_s19 }
 0x1d9   : > { %394 = vperm.xlu1 %587, %v392_v22  }
 0x247   : > { %v377_v25 = vpop.permute.xlu1 %376 }
 0x248   : > { %v379_v27 = vmul.f32 %v377_v25, %v374_v24 }
 0x24a   : > { %v384_v28 = vadd.f32 %v383_v26, %v379_v27 }
 0x24c   : > { %398 = vrot.lane.b32.xlu0 %v384_v28, %s609_s19 }
 0x254   : > { %v395_v34 = vpop.permute.xlu1 %394 }
 0x255   : > { %vm396_vm4 = vcmp.lt.s32.totalorder %v391_v33, %v395_v34 }
 0x2bc   : > { %407 = sbr.rel (%p543_p5) target bundleno = 1035 (0x40b), region = 56 }
 0x2be   : > { %v399_v35 = vpop.permute.xlu0 %398 }
 0x2bf   : > { %v401_v36 = vsel %vm396_vm4, %v399_v35, %v268_v5 }
 0x2c0   : > { %403 = vst.msk [vmem:[#allocation2] sm:$0x3f] %vm402_vm5, %v401_v36 }
 0x2c1   : > { %vm409_vm6 = vcmask 59392   ;;  %v424_v38 = vld [vmem:[%s717_s5 + $0x8] sm:$0xff]  ;;  %v611_v39 = vmov 0.0   ;;  %v423_v40 = vld [vmem:[%s717_s5] sm:$0xff]  ;;  %vm612_vm7 = vmmov 0   ;;  %vm415_vm8 = vcmask 128067  }
 0x2c2   : > { %561 = vmatprep.subr.mxu0 %v611_v39  ;;  %565 = vmatprep.mubr.msk.f32.mxu0 %vm612_vm7, %v611_v39  ;;  %v544_v44 = vld [vmem:[%s718_s6] ss:$0 sm:$0xff] }
 0x2c3   : > { %562 = vmatpush3.msra.mxu0 %v424_v38 }
 0x2c4   : > { %563 = vmatprep.subr.mxu0 %v611_v39 }
 0x2c5   : > { %564 = vmatpush3.msra.mxu0 %v423_v40 }
 0x2c7   : > { %v408_v37 = vld [vmem:[#allocation2] sm:$0x3f] }
 0x2c8   : > { %417 = vrot.lane.b32.xlu0 %v408_v37, %s610_s23  ;;  %410 = vst.msk [vmem:[#allocation3] sm:$0x7] %vm409_vm6, %v408_v37 }
 0x2cc   : > { %412 = vrot.lane.b32.xlu0 %v408_v37, %s613_s25 }
 0x33a   : > { %v418_v41 = vpop.permute.xlu0 %417 }
 0x33b   : > { %420 = vst.msk [vmem:[#allocation3 + $0x3] sm:$0x7] %vm409_vm6, %v418_v41 }
 0x33c   : > { %421 = vst.msk [vmem:[#allocation3] sm:$0x38] %vm415_vm8, %v408_v37 }
 0x33e   : > { %v413_v42 = vpop.permute.xlu0 %412 }
 0x33f   : > { %416 = vst.msk [vmem:[#allocation3 - $0x3] sm:$0x38] %vm415_vm8, %v413_v42 }
 0x346   : > { %v422_v43 = vld [vmem:[#allocation3] sm:$0x3f] }
 0x347   : > { %566 = vmatmul.mubr.msk.f32.vlgmr.msra.gmra.mxu0 %vm272_vm2, %v422_v43 }
 0x407   : > { %v501_v45 = vpop.f32.mrf.mxu0 }
 0x408   : > { %v502_v46 = vadd.f32 %v544_v44, %v501_v45 }
 0x409   : > { %v567_v47 = vpop.f32.mrf.mxu0 }
 0x40a   : > { %505 = vst.msk [vmem:[%s719_s7] sm:$0x3f] %vm402_vm5, %v502_v46 }
 0x40b PF: > { %s17_s24 = sadd.s32 1, %s601_s24  }
 0x40c   : > { %p14_p6 = scmp.ge.s32.totalorder %s17_s24, 7  }
 0x40e   :  { %16 = sbr.rel (!%p14_p6) target bundleno = 1 (0x1), region = 82 }

</bundles_post_ra>
